<compile_context>
chip_gen: v5e
topology: v5e:2x2
jax: 0.10.0
libtpu: 0.0.40
codegen_flags: <defaults>
</compile_context>

<pallas_src>
import functools

import jax
import jax.numpy as jnp
from jax.experimental import pallas as pl
from jax.experimental.pallas import tpu as pltpu

LEAKY = 0.2
NEG = -1e30     # "not seen yet" init for the neighbor max (always overwritten)
BIG = 1e30      # "already selected" distance marker in the kNN rounds

# Matmul input dtype. bf16 doubles MXU throughput / halves weight DMA on
# v5e/v6e/v7x; accumulation stays f32 (preferred_element_type). Set to
# jnp.float32 for closer parity with the PyTorch f32 reference.
MATMUL_DTYPE = jnp.bfloat16


# ----------------------------------------------------------------------------
# Kernel 1: per-point-cloud geometry + EdgeConv stack + proj + pooling
# ----------------------------------------------------------------------------
def _point_kernel(k, feature_dims, xyz_ref, rgb_ref, *refs):
    """refs = [wa_l, wd_l, bias_l, projw_l]*L + [proj_b] + [out_ref] + [sel_ref]."""
    n_layers = len(feature_dims)
    layer_refs = [tuple(refs[4 * l:4 * l + 4]) for l in range(n_layers)]
    proj_b_ref = refs[4 * n_layers]
    o_ref = refs[4 * n_layers + 1]
    sel_ref = refs[4 * n_layers + 2]           # VMEM scratch (k, N, N) bf16

    x = xyz_ref[0]                                     # (N, 3) f32
    N = x.shape[0]

    # ---- pairwise squared distances via Gram identity (MXU, lane-dense) -----
    x2 = x * x
    gram = jax.lax.dot_general(x, x, (((1,), (1,)), ((), ())),
                               preferred_element_type=jnp.float32)     # (N, N)
    sq_i = jnp.sum(x2, axis=1, keepdims=True)                          # (N, 1)
    # ||x_j||^2 in (1, N) lane layout via a tiny matmul (avoids a transpose)
    ones = jnp.ones((1, x.shape[1]), jnp.float32)
    sq_j = jax.lax.dot_general(ones, x2, (((1,), (1,)), ((), ())),
                               preferred_element_type=jnp.float32)     # (1, N)
    d = sq_i + sq_j - 2.0 * gram                                       # (N, N)

    # ---- on-chip kNN: k rounds of masked row-argmin ---------------------------
    # Each round writes a one-hot (N, N) selection matrix into sel_ref[r]; the
    # neighbor gather later happens on the MXU via sel_r @ features.
    col = jax.lax.broadcasted_iota(jnp.int32, (N, N), 1).astype(jnp.float32)

    def knn_round(r, dwork):
        rmin = jnp.min(dwork, axis=1, keepdims=True)                   # (N, 1)
        cand = jnp.where(dwork <= rmin, col, BIG)
        jstar = jnp.min(cand, axis=1, keepdims=True)   # lowest-index tie break
        sel = col == jstar                                             # (N, N)
        sel_ref[r] = jnp.where(sel, 1.0, 0.0).astype(MATMUL_DTYPE)
        return jnp.where(sel, BIG, dwork)

    jax.lax.fori_loop(0, k, knn_round, d)

    # ---- EdgeConv stack ------------------------------------------------------
    # Per layer (BN scale already folded into the weights at init):
    #   a_s = (Theta h_j) * scale            -> gathered over kNN, maxed
    #   t   = ((Phi - Theta) h_i) * scale + (bias*scale + shift)
    #   h'  = leaky_relu( max_{j in kNN(i)} a_s[j]  +  t[i] , 0.2)
    # proj(concat(feats)) is accumulated per layer against proj-weight slices.
    h = rgb_ref[0]                                      # (N, Cin0) f32
    E = proj_b_ref.shape[-1]
    pcat = jnp.zeros((N, E), jnp.float32)

    for (wa_ref, wd_ref, b_ref, pw_ref), cout in zip(layer_refs, feature_dims):
        h_bf = h.astype(MATMUL_DTYPE)
        a_s = jnp.dot(h_bf, wa_ref[...],
                      preferred_element_type=jnp.float32)              # (N, Cout)
        t = jnp.dot(h_bf, wd_ref[...],
                    preferred_element_type=jnp.float32) + b_ref[...]   # (N, Cout)

        a_bf = a_s.astype(MATMUL_DTYPE)

        def gather_max(r, cur, a_bf=a_bf):
            # one-hot row-gather on the MXU: picks a_s[j_r(i)] for every i
            g = jnp.dot(sel_ref[r], a_bf, preferred_element_type=jnp.float32)
            return jnp.maximum(cur, g)

        nmax = jax.lax.fori_loop(0, k, gather_max,
                                 jnp.full((N, cout), NEG, jnp.float32))

        y = nmax + t
        h = jnp.where(y > 0, y, LEAKY * y)                   # leaky_relu(0.2)
        pcat = pcat + jnp.dot(h.astype(MATMUL_DTYPE), pw_ref[...],
                              preferred_element_type=jnp.float32)

    # ---- proj bias + max/mean pooling over points (only (1,2E) hits HBM) -----
    pcat = pcat + proj_b_ref[...]
    gmax = jnp.max(pcat, axis=0, keepdims=True)              # (1, E)
    gavg = jnp.mean(pcat, axis=0, keepdims=True)             # (1, E)
    o_ref[...] = jnp.concatenate([gmax, gavg], axis=1)[None]  # (1, 1, 2E)


# ----------------------------------------------------------------------------
# Kernel 2: fused MLP head (Linear+BN(eval)+leaky)* + classifier Linear
# ----------------------------------------------------------------------------
def _head_kernel(n_emb, x_ref, *refs):
    """refs = [w_l, b_l]*n_emb + [out_w, out_b] + [out_ref]."""
    g = x_ref[...]                                           # (B, 2E) f32
    for l in range(n_emb):
        w_ref, b_ref = refs[2 * l], refs[2 * l + 1]
        g = jnp.dot(g.astype(MATMUL_DTYPE), w_ref[...],
                    preferred_element_type=jnp.float32) + b_ref[...]
        g = jnp.where(g > 0, g, LEAKY * g)
        # TODO(synk): Dropout is inference-mode identity here.
    ow_ref, ob_ref = refs[2 * n_emb], refs[2 * n_emb + 1]
    o_ref = refs[2 * n_emb + 2]
    o_ref[...] = jnp.dot(g.astype(MATMUL_DTYPE), ow_ref[...],
                         preferred_element_type=jnp.float32) + ob_ref[...]


# ----------------------------------------------------------------------------
# Wrappers
# ----------------------------------------------------------------------------
def _full_spec(arr):
    nd = arr.ndim
    return pl.BlockSpec(arr.shape, lambda b, nd=nd: (0,) * nd)


def _vmem_limit_bytes(N, k, cin0, feature_dims, E):
    """Generation-aware scoped-VMEM request for kernel 1."""
    f32, bf = 4, 2
    geom = 8 * N * N * f32                       # d/dwork/col/cand/sel temps
    sel = k * N * N * bf                         # one-hot scratch
    maxc = max(feature_dims + (E, cin0))
    act = 8 * N * maxc * f32                     # per-layer activations / pcat
    cins = (cin0,) + tuple(feature_dims[:-1])
    wts = sum(ci * co * 2 for ci, co in zip(cins, feature_dims)) * bf
    wts += sum(feature_dims) * E * bf
    need = geom + sel + act + 2 * wts + (1 << 20)
    want = max(2 * need, 32 * 1024 * 1024)       # generous margin, >= defaults
    try:
        cap = pltpu.get_tpu_info().vmem_capacity_bytes
    except Exception:
        cap = 64 * 1024 * 1024                   # v7x per-TC physical VMEM
    return int(min(want, int(cap * 0.9)))


def dgcnn_forward(params, xyz, rgb, k):
    B, N, dxyz = xyz.shape
    cin0 = rgb.shape[2]
    feature_dims = tuple(b.shape[1] for b in params["ec_bias"])
    E = params["proj_b"].shape[1]
    n_emb = len(params["emb_w"])
    OC = params["out_w"].shape[1]

    # ---- kernel 1: kNN + EdgeConv stack + proj + max/mean pool, grid over B --
    flat = []
    for wa, wd, bias, pw in zip(params["ec_wa"], params["ec_wd"],
                                params["ec_bias"], params["proj_w"]):
        flat += [wa, wd, bias, pw]
    flat += [params["proj_b"]]

    pooled = pl.pallas_call(
        functools.partial(_point_kernel, k, feature_dims),
        out_shape=jax.ShapeDtypeStruct((B, 1, 2 * E), jnp.float32),
        grid=(B,),
        in_specs=[pl.BlockSpec((1, N, dxyz), lambda b: (b, 0, 0)),
                  pl.BlockSpec((1, N, cin0), lambda b: (b, 0, 0))]
                 + [_full_spec(a) for a in flat],
        out_specs=pl.BlockSpec((1, 1, 2 * E), lambda b: (b, 0, 0)),
        scratch_shapes=[pltpu.VMEM((k, N, N), MATMUL_DTYPE)],
        compiler_params=pltpu.CompilerParams(
            dimension_semantics=("parallel",),
            vmem_limit_bytes=_vmem_limit_bytes(N, k, cin0, feature_dims, E)),
    )(xyz, rgb, *flat)
    pooled = pooled.reshape(B, 2 * E)

    # ---- kernel 2: whole MLP head + classifier in one call -------------------
    # (tiny work; kept in Pallas for a single fused call, cost is negligible)
    head_flat = []
    for w, b in zip(params["emb_w"], params["emb_b"]):
        head_flat += [w, b]
    head_flat += [params["out_w"], params["out_b"]]
    logits = pl.pallas_call(
        functools.partial(_head_kernel, n_emb),
        out_shape=jax.ShapeDtypeStruct((B, OC), jnp.float32),
        grid=(1,),
        in_specs=[_full_spec(pooled)] + [_full_spec(a) for a in head_flat],
        out_specs=pl.BlockSpec((B, OC), lambda i: (0, 0)),
        compiler_params=pltpu.CompilerParams(dimension_semantics=("arbitrary",)),
    )(pooled, *head_flat)
    return logits


# ----------------------------------------------------------------------------
# Parameters (BN eval stats + scales folded into weights; proj split per layer)
# ----------------------------------------------------------------------------
def init_params(key, input_dims, feature_dims, emb_dims, output_classes,
                bn_eps=1e-5):
    keys = iter(jax.random.split(key, 64))

    def kaiming(k_, fan_in, shape):
        return jax.random.normal(k_, shape, jnp.float32) * jnp.sqrt(2.0 / fan_in)

    def fold_bn(gamma, beta, mean, var, eps):
        # eval-mode BatchNorm folded to a per-channel affine (uses running stats;
        # with pretrained weights plug the real running_mean/var in here).
        inv = gamma / jnp.sqrt(var + eps)
        return inv, beta - mean * inv

    params = {"ec_wa": [], "ec_wd": [], "ec_bias": [],
              "proj_w": [], "emb_w": [], "emb_b": []}

    cin = input_dims
    for cout in feature_dims:
        wt = kaiming(next(keys), cin, (cin, cout))           # Theta^T
        wp = kaiming(next(keys), cin, (cin, cout))           # Phi^T
        lin_bias = jnp.zeros((cout,), jnp.float32)           # theta.bias + phi.bias
        gamma = 1.0 + 0.02 * jax.random.normal(next(keys), (cout,), jnp.float32)
        beta = jnp.zeros((cout,), jnp.float32)
        scale, shift = fold_bn(gamma, beta, jnp.zeros((cout,)), jnp.ones((cout,)),
                               bn_eps)
        # BN scale folded into the weights; Theta and (Phi - Theta) kept separate
        # so no mid-vreg lane slice is needed in the kernel.
        params["ec_wa"].append((wt * scale[None, :]).astype(MATMUL_DTYPE))
        params["ec_wd"].append(((wp - wt) * scale[None, :]).astype(MATMUL_DTYPE))
        params["ec_bias"].append(
            (lin_bias * scale + shift).reshape(1, cout).astype(jnp.float32))
        cin = cout

    # proj weight split per layer (avoids a lane-misaligned feature concat)
    sumf = sum(feature_dims)
    E = emb_dims[0]
    full_proj = kaiming(next(keys), sumf, (sumf, E))
    off = 0
    for cout in feature_dims:
        params["proj_w"].append(full_proj[off:off + cout].astype(MATMUL_DTYPE))
        off += cout
    params["proj_b"] = jnp.zeros((1, E), jnp.float32)

    for i in range(1, len(emb_dims)):
        din = emb_dims[i - 1] if i > 1 else emb_dims[0] * 2
        dout = emb_dims[i]
        w = kaiming(next(keys), din, (din, dout))
        b = jnp.zeros((dout,), jnp.float32)
        gamma = 1.0 + 0.02 * jax.random.normal(next(keys), (dout,), jnp.float32)
        beta = jnp.zeros((dout,), jnp.float32)
        scale, shift = fold_bn(gamma, beta, jnp.zeros((dout,)), jnp.ones((dout,)),
                               bn_eps)
        params["emb_w"].append((w * scale.reshape(1, dout)).astype(MATMUL_DTYPE))
        params["emb_b"].append((b * scale + shift).reshape(1, dout)
                               .astype(jnp.float32))

    dlast = emb_dims[-1]
    params["out_w"] = (0.001 * jax.random.normal(
        next(keys), (dlast, output_classes), jnp.float32)).astype(MATMUL_DTYPE)
    params["out_b"] = jnp.zeros((1, output_classes), jnp.float32)
    return params


if __name__ == "__main__":
    key = jax.random.PRNGKey(0)
    k_xyz, k_rgb, k_par = jax.random.split(key, 3)

    B, N = 2, 16
    K = 4
    input_dims = 3
    feature_dims = (8, 16)
    emb_dims = (32, 16)
    output_classes = 5

    xyz = jax.random.normal(k_xyz, (B, N, 3), jnp.float32)
    rgb = jax.random.normal(k_rgb, (B, N, input_dims), jnp.float32)

    params = init_params(k_par, input_dims, feature_dims, emb_dims,
                         output_classes)

    fwd = jax.jit(lambda p, a, b: dgcnn_forward(p, a, b, K))
    out = fwd(params, xyz, rgb)
    out = jax.block_until_ready(out)
    assert out.shape == (B, output_classes)
    assert bool(jnp.all(jnp.isfinite(out)))
    print("KERNEL_OK")
</pallas_src>

<mosaic_0001>
module attributes {stable_mosaic.version = 11 : i64} {
  func.func @_point_kernel(%arg0: i32, %arg1: memref<1x16x3xf32, #tpu.memory_space<vmem>>, %arg2: memref<1x16x3xf32, #tpu.memory_space<vmem>>, %arg3: memref<3x8xbf16, #tpu.memory_space<vmem>>, %arg4: memref<3x8xbf16, #tpu.memory_space<vmem>>, %arg5: memref<1x8xf32, #tpu.memory_space<vmem>>, %arg6: memref<8x32xbf16, #tpu.memory_space<vmem>>, %arg7: memref<8x16xbf16, #tpu.memory_space<vmem>>, %arg8: memref<8x16xbf16, #tpu.memory_space<vmem>>, %arg9: memref<1x16xf32, #tpu.memory_space<vmem>>, %arg10: memref<16x32xbf16, #tpu.memory_space<vmem>>, %arg11: memref<1x32xf32, #tpu.memory_space<vmem>>, %arg12: memref<1x1x64xf32, #tpu.memory_space<vmem>>, %arg13: memref<4x16x16xbf16, #tpu.memory_space<vmem>>) attributes {dimension_semantics = [#tpu.dimension_semantics<parallel>], iteration_bounds = array<i64: 2>, scalar_prefetch = 0 : i64, scratch_operands = 1 : i64, tpu.core_type = #tpu.core_type<tc>, window_params = [{transform_indices = @transform_0, window_bounds = array<i64: 1, 16, 3>}, {transform_indices = @transform_1, window_bounds = array<i64: 1, 16, 3>}, {pipeline_mode = #tpu.pipeline_mode<synchronous>, transform_indices = @transform_2, window_bounds = array<i64: 3, 8>}, {pipeline_mode = #tpu.pipeline_mode<synchronous>, transform_indices = @transform_3, window_bounds = array<i64: 3, 8>}, {pipeline_mode = #tpu.pipeline_mode<synchronous>, transform_indices = @transform_4, window_bounds = array<i64: 1, 8>}, {pipeline_mode = #tpu.pipeline_mode<synchronous>, transform_indices = @transform_5, window_bounds = array<i64: 8, 32>}, {pipeline_mode = #tpu.pipeline_mode<synchronous>, transform_indices = @transform_6, window_bounds = array<i64: 8, 16>}, {pipeline_mode = #tpu.pipeline_mode<synchronous>, transform_indices = @transform_7, window_bounds = array<i64: 8, 16>}, {pipeline_mode = #tpu.pipeline_mode<synchronous>, transform_indices = @transform_8, window_bounds = array<i64: 1, 16>}, {pipeline_mode = #tpu.pipeline_mode<synchronous>, transform_indices = @transform_9, window_bounds = array<i64: 16, 32>}, {pipeline_mode = #tpu.pipeline_mode<synchronous>, transform_indices = @transform_10, window_bounds = array<i64: 1, 32>}, {transform_indices = @transform_11, window_bounds = array<i64: 1, 1, 64>}]} {
    %c0 = arith.constant 0 : index
    %c0_0 = arith.constant 0 : index
    %c0_1 = arith.constant 0 : index
    %0 = vector.load %arg1[%c0, %c0_0, %c0_1] : memref<1x16x3xf32, #tpu.memory_space<vmem>>, vector<1x16x3xf32>
    %1 = vector.shape_cast %0 : vector<1x16x3xf32> to vector<16x3xf32>
    %2 = arith.mulf %1, %1 : vector<16x3xf32>
    %cst = arith.constant dense<0.000000e+00> : vector<16x16xf32>
    %3 = tpu.matmul %1, %1, %cst {dimension_numbers = #tpu.dot_dimension_numbers<[1], [1], [0], [0], [0, 0, 1, 0], [], []>} : vector<16x3xf32>, vector<16x3xf32>, vector<16x16xf32> -> vector<16x16xf32>
    %cst_2 = arith.constant dense<0.000000e+00> : vector<16xf32>
    %4 = vector.multi_reduction <add>, %2, %cst_2 [1] : vector<16x3xf32> to vector<16xf32>
    %5 = vector.shape_cast %4 : vector<16xf32> to vector<16x1xf32>
    %cst_3 = arith.constant 1.000000e+00 : f32
    %6 = vector.broadcast %cst_3 : f32 to vector<1x3xf32>
    %cst_4 = arith.constant dense<0.000000e+00> : vector<1x16xf32>
    %7 = tpu.matmul %6, %2, %cst_4 {dimension_numbers = #tpu.dot_dimension_numbers<[1], [1], [0], [0], [0, 0, 1, 0], [], []>} : vector<1x3xf32>, vector<16x3xf32>, vector<1x16xf32> -> vector<1x16xf32>
    %8 = vector.broadcast %5 : vector<16x1xf32> to vector<16x16xf32>
    %9 = vector.broadcast %7 : vector<1x16xf32> to vector<16x16xf32>
    %10 = arith.addf %8, %9 : vector<16x16xf32>
    %cst_5 = arith.constant 2.000000e+00 : f32
    %11 = vector.broadcast %cst_5 : f32 to vector<16x16xf32>
    %12 = arith.mulf %11, %3 : vector<16x16xf32>
    %13 = arith.subf %10, %12 : vector<16x16xf32>
    %14 = tpu.iota {dimensions = array<i32: 1>} : vector<16x16xi32>
    %15 = arith.sitofp %14 : vector<16x16xi32> to vector<16x16xf32>
    %c0_i32 = arith.constant 0 : i32
    %c4_i32 = arith.constant 4 : i32
    %16 = arith.addi %c0_i32, %c4_i32 : i32
    %c1_i32 = arith.constant 1 : i32
    %17 = scf.for %arg14 = %c0_i32 to %16 step %c1_i32 iter_args(%arg15 = %13) -> (vector<16x16xf32>)  : i32 {
      %cst_55 = arith.constant dense<0x7F800000> : vector<16xf32>
      %77 = vector.multi_reduction <minimumf>, %arg15, %cst_55 [1] : vector<16x16xf32> to vector<16xf32>
      %78 = vector.shape_cast %77 : vector<16xf32> to vector<16x1xf32>
      %79 = vector.broadcast %78 : vector<16x1xf32> to vector<16x16xf32>
      %80 = arith.cmpf ole, %arg15, %79 : vector<16x16xf32>
      %cst_56 = arith.constant 1.000000e+30 : f32
      %81 = vector.broadcast %cst_56 : f32 to vector<16x16xf32>
      %82 = arith.select %80, %15, %81 : vector<16x16xi1>, vector<16x16xf32>
      %cst_57 = arith.constant dense<0x7F800000> : vector<16xf32>
      %83 = vector.multi_reduction <minimumf>, %82, %cst_57 [1] : vector<16x16xf32> to vector<16xf32>
      %84 = vector.shape_cast %83 : vector<16xf32> to vector<16x1xf32>
      %85 = vector.broadcast %84 : vector<16x1xf32> to vector<16x16xf32>
      %86 = arith.cmpf oeq, %15, %85 : vector<16x16xf32>
      %cst_58 = arith.constant 1.000000e+00 : f32
      %cst_59 = arith.constant 0.000000e+00 : f32
      %87 = vector.broadcast %cst_58 : f32 to vector<16x16xf32>
      %88 = vector.broadcast %cst_59 : f32 to vector<16x16xf32>
      %89 = arith.select %86, %87, %88 : vector<16x16xi1>, vector<16x16xf32>
      %90 = arith.truncf %89 : vector<16x16xf32> to vector<16x16xbf16>
      %91 = arith.index_cast %arg14 : i32 to index
      %c0_60 = arith.constant 0 : index
      %c0_61 = arith.constant 0 : index
      %92 = vector.load %arg13[%91, %c0_60, %c0_61] : memref<4x16x16xbf16, #tpu.memory_space<vmem>>, vector<1x16x16xbf16>
      %93 = vector.shape_cast %92 : vector<1x16x16xbf16> to vector<16x16xbf16>
      %94 = vector.shape_cast %90 : vector<16x16xbf16> to vector<1x16x16xbf16>
      tpu.vector_store %arg13[%91, %c0_60, %c0_61], %94 {strides = array<i32>} : memref<4x16x16xbf16, #tpu.memory_space<vmem>>, vector<1x16x16xbf16>,
      %cst_62 = arith.constant 1.000000e+30 : f32
      %95 = vector.broadcast %cst_62 : f32 to vector<16x16xf32>
      %96 = arith.select %86, %95, %arg15 : vector<16x16xi1>, vector<16x16xf32>
      scf.yield %96 : vector<16x16xf32>
    }
    %c4_i32_6 = arith.constant 4 : i32
    %c0_7 = arith.constant 0 : index
    %c0_8 = arith.constant 0 : index
    %c0_9 = arith.constant 0 : index
    %18 = vector.load %arg2[%c0_7, %c0_8, %c0_9] : memref<1x16x3xf32, #tpu.memory_space<vmem>>, vector<1x16x3xf32>
    %19 = vector.shape_cast %18 : vector<1x16x3xf32> to vector<16x3xf32>
    %cst_10 = arith.constant 0.000000e+00 : f32
    %20 = vector.broadcast %cst_10 : f32 to vector<16x32xf32>
    %21 = arith.truncf %19 : vector<16x3xf32> to vector<16x3xbf16>
    %c0_11 = arith.constant 0 : index
    %c0_12 = arith.constant 0 : index
    %22 = vector.load %arg3[%c0_11, %c0_12] : memref<3x8xbf16, #tpu.memory_space<vmem>>, vector<3x8xbf16>
    %cst_13 = arith.constant dense<0.000000e+00> : vector<16x8xf32>
    %23 = tpu.matmul %21, %22, %cst_13 {dimension_numbers = #tpu.dot_dimension_numbers<[1], [0], [0], [1], [0, 0, 1, 1], [], []>} : vector<16x3xbf16>, vector<3x8xbf16>, vector<16x8xf32> -> vector<16x8xf32>
    %c0_14 = arith.constant 0 : index
    %c0_15 = arith.constant 0 : index
    %24 = vector.load %arg4[%c0_14, %c0_15] : memref<3x8xbf16, #tpu.memory_space<vmem>>, vector<3x8xbf16>
    %cst_16 = arith.constant dense<0.000000e+00> : vector<16x8xf32>
    %25 = tpu.matmul %21, %24, %cst_16 {dimension_numbers = #tpu.dot_dimension_numbers<[1], [0], [0], [1], [0, 0, 1, 1], [], []>} : vector<16x3xbf16>, vector<3x8xbf16>, vector<16x8xf32> -> vector<16x8xf32>
    %c0_17 = arith.constant 0 : index
    %c0_18 = arith.constant 0 : index
    %26 = vector.load %arg5[%c0_17, %c0_18] : memref<1x8xf32, #tpu.memory_space<vmem>>, vector<1x8xf32>
    %27 = vector.broadcast %26 : vector<1x8xf32> to vector<16x8xf32>
    %28 = arith.addf %25, %27 : vector<16x8xf32>
    %29 = arith.truncf %23 : vector<16x8xf32> to vector<16x8xbf16>
    %cst_19 = arith.constant -1.000000e+30 : f32
    %30 = vector.broadcast %cst_19 : f32 to vector<16x8xf32>
    %c0_i32_20 = arith.constant 0 : i32
    %c4_i32_21 = arith.constant 4 : i32
    %31 = arith.addi %c0_i32_20, %c4_i32_21 : i32
    %c1_i32_22 = arith.constant 1 : i32
    %32 = scf.for %arg14 = %c0_i32_20 to %31 step %c1_i32_22 iter_args(%arg15 = %30) -> (vector<16x8xf32>)  : i32 {
      %77 = arith.index_cast %arg14 : i32 to index
      %c0_55 = arith.constant 0 : index
      %c0_56 = arith.constant 0 : index
      %78 = vector.load %arg13[%77, %c0_55, %c0_56] : memref<4x16x16xbf16, #tpu.memory_space<vmem>>, vector<1x16x16xbf16>
      %79 = vector.shape_cast %78 : vector<1x16x16xbf16> to vector<16x16xbf16>
      %cst_57 = arith.constant dense<0.000000e+00> : vector<16x8xf32>
      %80 = tpu.matmul %79, %29, %cst_57 {dimension_numbers = #tpu.dot_dimension_numbers<[1], [0], [0], [1], [0, 0, 1, 1], [], []>} : vector<16x16xbf16>, vector<16x8xbf16>, vector<16x8xf32> -> vector<16x8xf32>
      %81 = arith.maximumf %arg15, %80 : vector<16x8xf32>
      scf.yield %81 : vector<16x8xf32>
    }
    %c4_i32_23 = arith.constant 4 : i32
    %33 = arith.addf %32, %28 : vector<16x8xf32>
    %cst_24 = arith.constant 0.000000e+00 : f32
    %34 = vector.broadcast %cst_24 : f32 to vector<16x8xf32>
    %35 = arith.cmpf ogt, %33, %34 : vector<16x8xf32>
    %cst_25 = arith.constant 2.000000e-01 : f32
    %36 = vector.broadcast %cst_25 : f32 to vector<16x8xf32>
    %37 = arith.mulf %36, %33 : vector<16x8xf32>
    %38 = arith.select %35, %33, %37 : vector<16x8xi1>, vector<16x8xf32>
    %39 = arith.truncf %38 : vector<16x8xf32> to vector<16x8xbf16>
    %c0_26 = arith.constant 0 : index
    %c0_27 = arith.constant 0 : index
    %40 = vector.load %arg6[%c0_26, %c0_27] : memref<8x32xbf16, #tpu.memory_space<vmem>>, vector<8x32xbf16>
    %cst_28 = arith.constant dense<0.000000e+00> : vector<16x32xf32>
    %41 = tpu.matmul %39, %40, %cst_28 {dimension_numbers = #tpu.dot_dimension_numbers<[1], [0], [0], [1], [0, 0, 1, 1], [], []>} : vector<16x8xbf16>, vector<8x32xbf16>, vector<16x32xf32> -> vector<16x32xf32>
    %42 = arith.addf %20, %41 : vector<16x32xf32>
    %43 = arith.truncf %38 : vector<16x8xf32> to vector<16x8xbf16>
    %c0_29 = arith.constant 0 : index
    %c0_30 = arith.constant 0 : index
    %44 = vector.load %arg7[%c0_29, %c0_30] : memref<8x16xbf16, #tpu.memory_space<vmem>>, vector<8x16xbf16>
    %cst_31 = arith.constant dense<0.000000e+00> : vector<16x16xf32>
    %45 = tpu.matmul %43, %44, %cst_31 {dimension_numbers = #tpu.dot_dimension_numbers<[1], [0], [0], [1], [0, 0, 1, 1], [], []>} : vector<16x8xbf16>, vector<8x16xbf16>, vector<16x16xf32> -> vector<16x16xf32>
    %c0_32 = arith.constant 0 : index
    %c0_33 = arith.constant 0 : index
    %46 = vector.load %arg8[%c0_32, %c0_33] : memref<8x16xbf16, #tpu.memory_space<vmem>>, vector<8x16xbf16>
    %cst_34 = arith.constant dense<0.000000e+00> : vector<16x16xf32>
    %47 = tpu.matmul %43, %46, %cst_34 {dimension_numbers = #tpu.dot_dimension_numbers<[1], [0], [0], [1], [0, 0, 1, 1], [], []>} : vector<16x8xbf16>, vector<8x16xbf16>, vector<16x16xf32> -> vector<16x16xf32>
    %c0_35 = arith.constant 0 : index
    %c0_36 = arith.constant 0 : index
    %48 = vector.load %arg9[%c0_35, %c0_36] : memref<1x16xf32, #tpu.memory_space<vmem>>, vector<1x16xf32>
    %49 = vector.broadcast %48 : vector<1x16xf32> to vector<16x16xf32>
    %50 = arith.addf %47, %49 : vector<16x16xf32>
    %51 = arith.truncf %45 : vector<16x16xf32> to vector<16x16xbf16>
    %cst_37 = arith.constant -1.000000e+30 : f32
    %52 = vector.broadcast %cst_37 : f32 to vector<16x16xf32>
    %c0_i32_38 = arith.constant 0 : i32
    %c4_i32_39 = arith.constant 4 : i32
    %53 = arith.addi %c0_i32_38, %c4_i32_39 : i32
    %c1_i32_40 = arith.constant 1 : i32
    %54 = scf.for %arg14 = %c0_i32_38 to %53 step %c1_i32_40 iter_args(%arg15 = %52) -> (vector<16x16xf32>)  : i32 {
      %77 = arith.index_cast %arg14 : i32 to index
      %c0_55 = arith.constant 0 : index
      %c0_56 = arith.constant 0 : index
      %78 = vector.load %arg13[%77, %c0_55, %c0_56] : memref<4x16x16xbf16, #tpu.memory_space<vmem>>, vector<1x16x16xbf16>
      %79 = vector.shape_cast %78 : vector<1x16x16xbf16> to vector<16x16xbf16>
      %cst_57 = arith.constant dense<0.000000e+00> : vector<16x16xf32>
      %80 = tpu.matmul %79, %51, %cst_57 {dimension_numbers = #tpu.dot_dimension_numbers<[1], [0], [0], [1], [0, 0, 1, 1], [], []>} : vector<16x16xbf16>, vector<16x16xbf16>, vector<16x16xf32> -> vector<16x16xf32>
      %81 = arith.maximumf %arg15, %80 : vector<16x16xf32>
      scf.yield %81 : vector<16x16xf32>
    }
    %c4_i32_41 = arith.constant 4 : i32
    %55 = arith.addf %54, %50 : vector<16x16xf32>
    %cst_42 = arith.constant 0.000000e+00 : f32
    %56 = vector.broadcast %cst_42 : f32 to vector<16x16xf32>
    %57 = arith.cmpf ogt, %55, %56 : vector<16x16xf32>
    %cst_43 = arith.constant 2.000000e-01 : f32
    %58 = vector.broadcast %cst_43 : f32 to vector<16x16xf32>
    %59 = arith.mulf %58, %55 : vector<16x16xf32>
    %60 = arith.select %57, %55, %59 : vector<16x16xi1>, vector<16x16xf32>
    %61 = arith.truncf %60 : vector<16x16xf32> to vector<16x16xbf16>
    %c0_44 = arith.constant 0 : index
    %c0_45 = arith.constant 0 : index
    %62 = vector.load %arg10[%c0_44, %c0_45] : memref<16x32xbf16, #tpu.memory_space<vmem>>, vector<16x32xbf16>
    %cst_46 = arith.constant dense<0.000000e+00> : vector<16x32xf32>
    %63 = tpu.matmul %61, %62, %cst_46 {dimension_numbers = #tpu.dot_dimension_numbers<[1], [0], [0], [1], [0, 0, 1, 1], [], []>} : vector<16x16xbf16>, vector<16x32xbf16>, vector<16x32xf32> -> vector<16x32xf32>
    %64 = arith.addf %42, %63 : vector<16x32xf32>
    %c0_47 = arith.constant 0 : index
    %c0_48 = arith.constant 0 : index
    %65 = vector.load %arg11[%c0_47, %c0_48] : memref<1x32xf32, #tpu.memory_space<vmem>>, vector<1x32xf32>
    %66 = vector.broadcast %65 : vector<1x32xf32> to vector<16x32xf32>
    %67 = arith.addf %64, %66 : vector<16x32xf32>
    %cst_49 = arith.constant dense<0xFF800000> : vector<32xf32>
    %68 = vector.multi_reduction <maximumf>, %67, %cst_49 [0] : vector<16x32xf32> to vector<32xf32>
    %69 = vector.shape_cast %68 : vector<32xf32> to vector<1x32xf32>
    %cst_50 = arith.constant dense<0.000000e+00> : vector<32xf32>
    %70 = vector.multi_reduction <add>, %67, %cst_50 [0] : vector<16x32xf32> to vector<32xf32>
    %71 = vector.shape_cast %70 : vector<32xf32> to vector<1x32xf32>
    %cst_51 = arith.constant 1.600000e+01 : f32
    %72 = vector.broadcast %cst_51 : f32 to vector<1x32xf32>
    %73 = arith.divf %71, %72 : vector<1x32xf32>
    %74 = tpu.concatenate %69, %73 in 1 : vector<1x32xf32>, vector<1x32xf32> -> vector<1x64xf32>
    %75 = vector.shape_cast %74 : vector<1x64xf32> to vector<1x1x64xf32>
    %c0_52 = arith.constant 0 : index
    %c0_53 = arith.constant 0 : index
    %c0_54 = arith.constant 0 : index
    %76 = vector.load %arg12[%c0_52, %c0_53, %c0_54] : memref<1x1x64xf32, #tpu.memory_space<vmem>>, vector<1x1x64xf32>
    tpu.vector_store %arg12[%c0_52, %c0_53, %c0_54], %75 {strides = array<i32>} : memref<1x1x64xf32, #tpu.memory_space<vmem>>, vector<1x1x64xf32>,
    return
  }
  func.func @transform_0(%arg0: i32) -> (i32, i32, i32) {
    %c0_i32 = arith.constant 0 : i32
    %c0_i32_0 = arith.constant 0 : i32
    %c0_i32_1 = arith.constant 0 : i32
    return %arg0, %c0_i32, %c0_i32_0 : i32, i32, i32
  }
  func.func @transform_1(%arg0: i32) -> (i32, i32, i32) {
    %c0_i32 = arith.constant 0 : i32
    %c0_i32_0 = arith.constant 0 : i32
    %c0_i32_1 = arith.constant 0 : i32
    return %arg0, %c0_i32, %c0_i32_0 : i32, i32, i32
  }
  func.func @transform_2(%arg0: i32) -> (i32, i32) {
    %c0_i32 = arith.constant 0 : i32
    %c0_i32_0 = arith.constant 0 : i32
    %c0_i32_1 = arith.constant 0 : i32
    return %c0_i32, %c0_i32_0 : i32, i32
  }
  func.func @transform_3(%arg0: i32) -> (i32, i32) {
    %c0_i32 = arith.constant 0 : i32
    %c0_i32_0 = arith.constant 0 : i32
    %c0_i32_1 = arith.constant 0 : i32
    return %c0_i32, %c0_i32_0 : i32, i32
  }
  func.func @transform_4(%arg0: i32) -> (i32, i32) {
    %c0_i32 = arith.constant 0 : i32
    %c0_i32_0 = arith.constant 0 : i32
    %c0_i32_1 = arith.constant 0 : i32
    return %c0_i32, %c0_i32_0 : i32, i32
  }
  func.func @transform_5(%arg0: i32) -> (i32, i32) {
    %c0_i32 = arith.constant 0 : i32
    %c0_i32_0 = arith.constant 0 : i32
    %c0_i32_1 = arith.constant 0 : i32
    return %c0_i32, %c0_i32_0 : i32, i32
  }
  func.func @transform_6(%arg0: i32) -> (i32, i32) {
    %c0_i32 = arith.constant 0 : i32
    %c0_i32_0 = arith.constant 0 : i32
    %c0_i32_1 = arith.constant 0 : i32
    return %c0_i32, %c0_i32_0 : i32, i32
  }
  func.func @transform_7(%arg0: i32) -> (i32, i32) {
    %c0_i32 = arith.constant 0 : i32
    %c0_i32_0 = arith.constant 0 : i32
    %c0_i32_1 = arith.constant 0 : i32
    return %c0_i32, %c0_i32_0 : i32, i32
  }
  func.func @transform_8(%arg0: i32) -> (i32, i32) {
    %c0_i32 = arith.constant 0 : i32
    %c0_i32_0 = arith.constant 0 : i32
    %c0_i32_1 = arith.constant 0 : i32
    return %c0_i32, %c0_i32_0 : i32, i32
  }
  func.func @transform_9(%arg0: i32) -> (i32, i32) {
    %c0_i32 = arith.constant 0 : i32
    %c0_i32_0 = arith.constant 0 : i32
    %c0_i32_1 = arith.constant 0 : i32
    return %c0_i32, %c0_i32_0 : i32, i32
  }
  func.func @transform_10(%arg0: i32) -> (i32, i32) {
    %c0_i32 = arith.constant 0 : i32
    %c0_i32_0 = arith.constant 0 : i32
    %c0_i32_1 = arith.constant 0 : i32
    return %c0_i32, %c0_i32_0 : i32, i32
  }
  func.func @transform_11(%arg0: i32) -> (i32, i32, i32) {
    %c0_i32 = arith.constant 0 : i32
    %c0_i32_0 = arith.constant 0 : i32
    %c0_i32_1 = arith.constant 0 : i32
    return %arg0, %c0_i32, %c0_i32_0 : i32, i32, i32
  }
}

module attributes {stable_mosaic.version = 11 : i64} {
  func.func @_head_kernel(%arg0: i32, %arg1: memref<2x64xf32, #tpu.memory_space<vmem>>, %arg2: memref<64x16xbf16, #tpu.memory_space<vmem>>, %arg3: memref<1x16xf32, #tpu.memory_space<vmem>>, %arg4: memref<16x5xbf16, #tpu.memory_space<vmem>>, %arg5: memref<1x5xf32, #tpu.memory_space<vmem>>, %arg6: memref<2x5xf32, #tpu.memory_space<vmem>>) attributes {dimension_semantics = [#tpu.dimension_semantics<arbitrary>], iteration_bounds = array<i64: 1>, scalar_prefetch = 0 : i64, scratch_operands = 0 : i64, tpu.core_type = #tpu.core_type<tc>, window_params = [{pipeline_mode = #tpu.pipeline_mode<synchronous>, transform_indices = @transform_0, window_bounds = array<i64: 2, 64>}, {pipeline_mode = #tpu.pipeline_mode<synchronous>, transform_indices = @transform_1, window_bounds = array<i64: 64, 16>}, {pipeline_mode = #tpu.pipeline_mode<synchronous>, transform_indices = @transform_2, window_bounds = array<i64: 1, 16>}, {pipeline_mode = #tpu.pipeline_mode<synchronous>, transform_indices = @transform_3, window_bounds = array<i64: 16, 5>}, {pipeline_mode = #tpu.pipeline_mode<synchronous>, transform_indices = @transform_4, window_bounds = array<i64: 1, 5>}, {pipeline_mode = #tpu.pipeline_mode<synchronous>, transform_indices = @transform_5, window_bounds = array<i64: 2, 5>}]} {
    %c0 = arith.constant 0 : index
    %c0_0 = arith.constant 0 : index
    %0 = vector.load %arg1[%c0, %c0_0] : memref<2x64xf32, #tpu.memory_space<vmem>>, vector<2x64xf32>
    %1 = arith.truncf %0 : vector<2x64xf32> to vector<2x64xbf16>
    %c0_1 = arith.constant 0 : index
    %c0_2 = arith.constant 0 : index
    %2 = vector.load %arg2[%c0_1, %c0_2] : memref<64x16xbf16, #tpu.memory_space<vmem>>, vector<64x16xbf16>
    %cst = arith.constant dense<0.000000e+00> : vector<2x16xf32>
    %3 = tpu.matmul %1, %2, %cst {dimension_numbers = #tpu.dot_dimension_numbers<[1], [0], [0], [1], [0, 0, 1, 1], [], []>} : vector<2x64xbf16>, vector<64x16xbf16>, vector<2x16xf32> -> vector<2x16xf32>
    %c0_3 = arith.constant 0 : index
    %c0_4 = arith.constant 0 : index
    %4 = vector.load %arg3[%c0_3, %c0_4] : memref<1x16xf32, #tpu.memory_space<vmem>>, vector<1x16xf32>
    %5 = vector.broadcast %4 : vector<1x16xf32> to vector<2x16xf32>
    %6 = arith.addf %3, %5 : vector<2x16xf32>
    %cst_5 = arith.constant 0.000000e+00 : f32
    %7 = vector.broadcast %cst_5 : f32 to vector<2x16xf32>
    %8 = arith.cmpf ogt, %6, %7 : vector<2x16xf32>
    %cst_6 = arith.constant 2.000000e-01 : f32
    %9 = vector.broadcast %cst_6 : f32 to vector<2x16xf32>
    %10 = arith.mulf %9, %6 : vector<2x16xf32>
    %11 = arith.select %8, %6, %10 : vector<2x16xi1>, vector<2x16xf32>
    %12 = arith.truncf %11 : vector<2x16xf32> to vector<2x16xbf16>
    %c0_7 = arith.constant 0 : index
    %c0_8 = arith.constant 0 : index
    %13 = vector.load %arg4[%c0_7, %c0_8] : memref<16x5xbf16, #tpu.memory_space<vmem>>, vector<16x5xbf16>
    %cst_9 = arith.constant dense<0.000000e+00> : vector<2x5xf32>
    %14 = tpu.matmul %12, %13, %cst_9 {dimension_numbers = #tpu.dot_dimension_numbers<[1], [0], [0], [1], [0, 0, 1, 1], [], []>} : vector<2x16xbf16>, vector<16x5xbf16>, vector<2x5xf32> -> vector<2x5xf32>
    %c0_10 = arith.constant 0 : index
    %c0_11 = arith.constant 0 : index
    %15 = vector.load %arg5[%c0_10, %c0_11] : memref<1x5xf32, #tpu.memory_space<vmem>>, vector<1x5xf32>
    %16 = vector.broadcast %15 : vector<1x5xf32> to vector<2x5xf32>
    %17 = arith.addf %14, %16 : vector<2x5xf32>
    %c0_12 = arith.constant 0 : index
    %c0_13 = arith.constant 0 : index
    %18 = vector.load %arg6[%c0_12, %c0_13] : memref<2x5xf32, #tpu.memory_space<vmem>>, vector<2x5xf32>
    tpu.vector_store %arg6[%c0_12, %c0_13], %17 {strides = array<i32>} : memref<2x5xf32, #tpu.memory_space<vmem>>, vector<2x5xf32>,
    return
  }
  func.func @transform_0(%arg0: i32) -> (i32, i32) {
    %c0_i32 = arith.constant 0 : i32
    %c0_i32_0 = arith.constant 0 : i32
    %c0_i32_1 = arith.constant 0 : i32
    return %c0_i32, %c0_i32_0 : i32, i32
  }
  func.func @transform_1(%arg0: i32) -> (i32, i32) {
    %c0_i32 = arith.constant 0 : i32
    %c0_i32_0 = arith.constant 0 : i32
    %c0_i32_1 = arith.constant 0 : i32
    return %c0_i32, %c0_i32_0 : i32, i32
  }
  func.func @transform_2(%arg0: i32) -> (i32, i32) {
    %c0_i32 = arith.constant 0 : i32
    %c0_i32_0 = arith.constant 0 : i32
    %c0_i32_1 = arith.constant 0 : i32
    return %c0_i32, %c0_i32_0 : i32, i32
  }
  func.func @transform_3(%arg0: i32) -> (i32, i32) {
    %c0_i32 = arith.constant 0 : i32
    %c0_i32_0 = arith.constant 0 : i32
    %c0_i32_1 = arith.constant 0 : i32
    return %c0_i32, %c0_i32_0 : i32, i32
  }
  func.func @transform_4(%arg0: i32) -> (i32, i32) {
    %c0_i32 = arith.constant 0 : i32
    %c0_i32_0 = arith.constant 0 : i32
    %c0_i32_1 = arith.constant 0 : i32
    return %c0_i32, %c0_i32_0 : i32, i32
  }
  func.func @transform_5(%arg0: i32) -> (i32, i32) {
    %c0_i32 = arith.constant 0 : i32
    %c0_i32_0 = arith.constant 0 : i32
    %c0_i32_1 = arith.constant 0 : i32
    return %c0_i32, %c0_i32_0 : i32, i32
  }
}

</mosaic_0001>

<bundles_post_ra>
// kernel: _lambda_.3
= control target key start
LH: loop header
LB: loop body
LE: loop exit
PB: predicated region body
PF: predicated region fallthrough
CT: control target
= control target key end

     0   :  { %s242_s0 = inlined_call_operand.vmem [shape: f32[2,64], index: 0, kind: input, shape index: {}]   ;;  %s243_s1 = inlined_call_operand.vmem [shape: bf16[64,16], index: 1, kind: input, shape index: {}]   ;;  %s244_s2 = inlined_call_operand.vmem [shape: f32[1,16], index: 2, kind: input, shape index: {}]   ;;  %s245_s3 = inlined_call_operand.vmem [shape: bf16[16,5], index: 3, kind: input, shape index: {}]   ;;  %s246_s4 = inlined_call_operand.vmem [shape: f32[1,5], index: 4, kind: input, shape index: {}]   ;;  %s247_s5 = inlined_call_operand.hbm [shape: f32[2,5], index: 5, kind: output, shape index: {}]  }
   0x1   :  { %v153_v0 = vld [vmem:[%s243_s1 + $0x18] sm:$0xff]  ;;  %v152_v1 = vld [vmem:[%s243_s1 + $0x10] sm:$0xff] }
   0x2   :  { %68 = vmatpush.bf16.msra.mxu0 %v153_v0 }
   0x3   :  { %10 = vsyncpa [#allocation3], 0  ;;  %v151_v2 = vld [vmem:[%s243_s1 + $0x8] sm:$0xff]  ;;  %v150_v3 = vld [vmem:[%s243_s1] sm:$0xff]  ;;  %vm60_vm0 = vcmask 523264   ;;  %vm93_vm2 = vcmask 130048  }
   0x4   :  { %v22_v4 = vld [vmem:[%s242_s0] sm:$0x3]  ;;  %s184_s7 = smov [#allocation2]   ;;  %s119_s10 = sshll.u32 %s247_s5, 4  ;;  %vm110_vm3 = vcmask 33792   ;;  %s120_s10 = int_to_ptr.hbm [resolvable:$true] %s119_s10 }
   0x5   :  { %v23_v5 = vpack.c.bf16 %v22_v4, %v22_v4  ;;  %v154_v6 = vld [vmem:[%s245_s3] sm:$0xff]  ;;  %s117_s3 = sshll.u32 %s184_s7, 4  ;;  %s118_s3 = int_to_ptr.vmem [resolvable:$true] %s117_s3 }
   0x6   :  { %69 = vmatpush.bf16.msra.mxu0 %v152_v1  ;;  %104 = vmatpush.bf16.msra.mxu1 %v154_v6  ;;  %v156_v7 = vld [vmem:[%s244_s2] ss:$0 sm:$0xff] }
   0x7   :  { %v157_v14 = vld [vmem:[%s246_s4] ss:$0 sm:$0xff] }
   0xa   :  { %70 = vmatpush.bf16.msra.mxu0 %v151_v2 }
   0xe   :  { %71 = vmatpush.bf16.msra.mxu0 %v150_v3 }
  0x11   :  { %144 = vmatmul.msk.bf16.vlgmr.msra.gmra.mxu0 %vm60_vm0, %v23_v5 }
  0x8e   :  { %v73_v8 = vpop.f32.mrf.mxu0 }
  0x8f   :  { %v74_v9 = vadd.f32 %v156_v7, %v73_v8 }
  0x91   :  { %vm77_vm1 = vcmp.gt.f32.partialorder %v74_v9, 0.0  ;;  %v78_v10 = vmul.f32 0.2, %v74_v9 }
  0x93   :  { %v79_v11 = vsel %vm77_vm1, %v74_v9, %v78_v10 }
  0x94   :  { %v80_v12 = vpack.c.bf16 %v79_v11, %v79_v11 }
  0x96   :  { %v75_v13 = vpop.f32.mrf.mxu0  ;;  %149 = vmatmul.msk.bf16.vlgmr.msra.gmra.mxu1 %vm93_vm2, %v80_v12 }
 0x113   :  { %v106_v15 = vpop.f32.mrf.mxu1 }
 0x114   :  { %v107_v16 = vadd.f32 %v157_v14, %v106_v15 }
 0x116   :  { %111 = vst.msk [vmem:[#allocation2] sm:$0x3] %vm110_vm3, %v107_v16 }
 0x117   :  { %122 = dma.vmem_to_hbm [thread:$0]  %s118_s3, 32, %s120_s10, [#allocation3]  }
 0x11b   :  { %v108_v17 = vpop.f32.mrf.mxu1 }
 0x11c   :  { %182 = dma.done.wait [#allocation3], 32  }
 0x11d   :  { %183 = vsyncadd [#allocation3], 4294967264 }
 0x11e   :  { %127 = vsyncpa [#allocation3], 1 }

// kernel: _lambda_.2
= control target key start
LH: loop header
LB: loop body
LE: loop exit
PB: predicated region body
PF: predicated region fallthrough
CT: control target
= control target key end

     0   :  { %s1182_s17 = smov 0   ;;  %s1280_s0 = inlined_call_operand.vmem [shape: f32[2,16,3], index: 0, kind: input, shape index: {}]   ;;  %s1281_s1 = inlined_call_operand.vmem [shape: f32[2,16,3], index: 1, kind: input, shape index: {}]   ;;  %s1282_s2 = inlined_call_operand.vmem [shape: bf16[3,8], index: 2, kind: input, shape index: {}]   ;;  %s1283_s3 = inlined_call_operand.vmem [shape: bf16[3,8], index: 3, kind: input, shape index: {}]   ;;  %s1284_s4 = inlined_call_operand.vmem [shape: f32[1,8], index: 4, kind: input, shape index: {}]   ;;  %s1285_s5 = inlined_call_operand.vmem [shape: bf16[8,32], index: 5, kind: input, shape index: {}]   ;;  %s1286_s6 = inlined_call_operand.vmem [shape: bf16[8,16], index: 6, kind: input, shape index: {}]   ;;  %s1287_s7 = inlined_call_operand.vmem [shape: bf16[8,16], index: 7, kind: input, shape index: {}]   ;;  %s1288_s8 = inlined_call_operand.vmem [shape: f32[1,16], index: 8, kind: input, shape index: {}]   ;;  %s1289_s9 = inlined_call_operand.vmem [shape: bf16[16,32], index: 9, kind: input, shape index: {}]   ;;  %s1290_s10 = inlined_call_operand.vmem [shape: f32[1,32], index: 10, kind: input, shape index: {}]   ;;  %s1291_s11 = inlined_call_operand.vmem [shape: f32[2,1,64], index: 11, kind: output, shape index: {}]  }
   0x1 LB: > { %s895_s18 = sadd.s32 4294967295, %s1079_s17   ;;  %p899_p0 = scmp.ge.s32.totalorder %s1079_s17, 1  ;;  %s1079_s17 = sphi %s1182_s17, %s21_s17  }
   0x2   : > { %p347_p1 = scmp.lt.s32.totalorder %s1079_s17, 3 }
   0x4   : > { %p348_p2 = pnand %p899_p0, %p347_p1 }
   0x5   : > { %p390_p3 = scmp.lt.s32.totalorder (!%p348_p2), %s895_s18, 1  ;;  %s1214_s29 = smov (!%p348_p2), 0  }
   0x6   : > { %351 = sbr.rel (%p348_p2) target bundleno = 1115 (0x45b), region = 64 }
   0xb   : > { %s1293_s18 = smov (!%p390_p3, %s895_s18), 1  ;;  %vm408_vm0 = vcmask 23552   ;;  %v1117_v6 = vmov 1.0   ;;  %v480_v7 = vlaneseq }
   0xc   : > { %s939_s19 = sshll.u32 %s1293_s18, 4  ;;  %s402_s22 = scalar_lea.vmem %s1291_s11, %s1293_s18 }
   0xd   : > { %s394_s25 = scalar_lea.vmem %s1280_s0, %s939_s19  ;;  %s1203_s28 = scalar_lea.vmem %s1281_s1, %s939_s19  ;;  %v481_v8 = vand.u32 127, %v480_v7 }
   0xe   : > { %v405_v0 = vld [vmem:[%s394_s25 + $0x8] sm:$0xff]  ;;  %v404_v1 = vld [vmem:[%s394_s25] sm:$0xff] }
   0xf   : > { %904 = vmatpush.xpose.msk.msra.mxu0 %vm408_vm0, %v405_v0  ;;  %v407_v2 = vmul.f32 %v405_v0, %v405_v0  ;;  %v406_v3 = vmul.f32 %v404_v1, %v404_v1  ;;  %v482_v9 = vcvt.s32.f32 %v481_v8 }
  0x11   : > { %908 = vmatpush.xpose.msk.msra.mxu1 %vm408_vm0, %v407_v2  ;;  %v438_v4 = vsel %vm408_vm0, %v406_v3, 0.0  ;;  %v441_v5 = vsel %vm408_vm0, %v407_v2, 0.0 }
  0x12   : > { %439 = vadd.xlane.f32.xlu0 %v438_v4 }
  0x13   : > { %905 = vmatpush.xpose.msk.msra.mxu0 %vm408_vm0, %v404_v1 }
  0x15   : > { %909 = vmatpush.xpose.msk.msra.mxu1 %vm408_vm0, %v406_v3 }
  0x16   : > { %906 = vmatmul.msk.f32.vlgmr.msra.gmra.mxu0 %vm408_vm0, %v404_v1 }
  0x18   : > { %910 = vmatmul.msk.f32.vlgmr.msra.gmra.mxu1 %vm408_vm0, %v1117_v6 }
  0x1a   : > { %442 = vadd.xlane.f32.xlu0 %v441_v5 }
  0x1e   : > { %907 = vmatmul.msk.f32.gmra.mxu0 %vm408_vm0, %v405_v0 }
  0x85   : > { %v440_v10 = vpop.xlane.xlu0 %439 }
  0x8d   : > { %v443_v14 = vpop.xlane.xlu0 %442 }
  0x93   : > { %v432_v11 = vpop.f32.mrf.mxu0 }
  0x94   : > { %v476_v15 = vmul.f32 2.0, %v432_v11 }
  0x95   : > { %v470_v12 = vpop.f32.mrf.mxu1 }
  0x96   : > { %v473_v13 = vperm.slane %v470_v12, 0 }
  0x98   : > { %v474_v16 = vadd.f32 %v473_v13, %v440_v10  ;;  %v475_v18 = vadd.f32 %v473_v13, %v443_v14 }
  0x9a   : > { %v478_v17 = vsub.f32 %v474_v16, %v476_v15  }
  0x9b   : > { %v435_v19 = vpop.f32.mrf.mxu0 }
  0x9c   : > { %v477_v20 = vmul.f32 2.0, %v435_v19  ;;  %v1085_v23 = vmov %v478_v17  }
  0x9e   : > { %v479_v21 = vsub.f32 %v475_v18, %v477_v20  }
  0xa0   : > { %v1081_v22 = vmov %v479_v21  }
  0xa1 LB: >> { %vm491_vm1 = vcmask 130048   ;;  %s941_s30 = sshll.u32 %s1091_s29, 3  ;;  %vm517_vm5 = vcmask 125952   ;;  %v1118_v33 = vmov 0.0   ;;  %s488_s29 = sadd.s32 1, %s1091_s29   ;;  %s1091_s29 = sphi %s1214_s29, %s488_s29   ;;  %v1087_v23 = vphi %v1085_v23, %v520_v23   ;;  %v1083_v22 = vphi %v1081_v22, %v521_v22  }
  0xa2   : >> { %v492_v24 = vsel %vm491_vm1, %v1087_v23, inf  ;;  %v495_v25 = vsel %vm491_vm1, %v1083_v22, inf  ;;  %s516_s12 = scalar_lea.vmem [#allocation2], %s941_s30  ;;  %p485_p4 = scmp.ge.s32.totalorder %s488_s29, 4  }
  0xa3   : >> { %493 = vmin.xlane.f32.xlu0 %v492_v24  ;;  %v525_v39 = vld [vmem:[%s1282_s2] sm:$0x3] (%p485_p4)  ;;  %vm529_vm7 = vcmask (%p485_p4), 1040384   ;;  %vm530_vm8 = vcmask (%p485_p4), 1041408   ;;  %v1119_v41 = vmov (%p485_p4), 65535   ;;  %v523_v44 = vld [vmem:[%s1203_s28 + $0x8] sm:$0xff] (%p485_p4) }
  0xa4   : > { %v522_v40 = vld [vmem:[%s1203_s28] sm:$0xff] (%p485_p4)  ;;  %v531_v42 = vsel (%p485_p4), %vm529_vm7, 4294967295, %v1119_v41  ;;  %v1093_v57 = vmov (%p485_p4), -1e+30   ;;  %v1097_v58 = vmov (%p485_p4), -1e+30  }
  0xa5   : > { %v550_v43 = vld [vmem:[%s1283_s3] sm:$0x3] (%p485_p4)  ;;  %v532_v45 = vsel (%p485_p4), %vm530_vm8, %v531_v42, 0  ;;  %v524_v48 = vpack.c.bf16 (%p485_p4), %v523_v44, %v522_v40  ;;  %s1101_s21 = smov (%p485_p4), 0  }
  0xa6   : > { %v534_v46 = vand.u32 (%p485_p4), %v532_v45, %v525_v39  ;;  %v556_v47 = vand.u32 (%p485_p4), %v550_v43, %v532_v45  ;;  %v1032_v49 = vld [vmem:[%s1284_s4] ss:$0 sm:$0xff] (%p485_p4) }
  0xa8   : > { %543 = vmatpush.bf16.msra.mxu2 (%p485_p4), %v534_v46  ;;  %565 = vmatpush.bf16.msra.mxu3 (%p485_p4), %v556_v47 }
  0xab   : >> { %496 = vmin.xlane.f32.xlu0 %v495_v25  ;;  %913 = vmatmul.msk.bf16.vlgmr.msra.gmra.mxu2 (%p485_p4), %vm408_vm0, %v524_v48 }
  0xac   : > { %914 = vmatmul.msk.bf16.vlgmr.msra.gmra.mxu3 (%p485_p4), %vm408_vm0, %v524_v48 }
 0x116   : >> { %v494_v26 = vpop.xlane.xlu0 %493 }
 0x117   : >> { %vm498_vm2 = vcmp.le.f32.partialorder %v1087_v23, %v494_v26 }
 0x118   : >> { %v500_v27 = vsel %vm498_vm2, %v482_v9, 1e+30 }
 0x119   : >> { %v502_v28 = vsel %vm491_vm1, %v500_v27, inf }
 0x11a   : >> { %503 = vmin.xlane.f32.xlu1 %v502_v28 }
 0x11e   : >> { %v497_v29 = vpop.xlane.xlu0 %496 }
 0x11f   : >> { %vm499_vm3 = vcmp.le.f32.partialorder %v1083_v22, %v497_v29 }
 0x120   : >> { %v501_v30 = vsel %vm499_vm3, %v482_v9, 1e+30 }
 0x121   : >> { %v505_v31 = vsel %vm491_vm1, %v501_v30, inf }
 0x122   : >> { %506 = vmin.xlane.f32.xlu1 %v505_v31 }
 0x12e   : > { %v545_v50 = vpop.f32.mrf.mxu2 (%p485_p4) }
 0x12f   : > { %v567_v51 = vpop.f32.mrf.mxu3 (%p485_p4) }
 0x130   : > { %v568_v52 = vadd.f32 (%p485_p4), %v1032_v49, %v567_v51 }
 0x136   : > { %v547_v53 = vpop.f32.mrf.mxu2 (%p485_p4) }
 0x137   : > { %v569_v54 = vpop.f32.mrf.mxu3 (%p485_p4)  ;;  %v572_v55 = vpack.c.bf16 (%p485_p4), %v547_v53, %v545_v50 }
 0x138   : > { %v570_v56 = vadd.f32 (%p485_p4), %v1032_v49, %v569_v54 }
 0x18d   : >> { %v504_v32 = vpop.xlane.xlu1 %503 }
 0x18e   : >> { %vm508_vm4 = vcmp.eq.f32.partialorder %v482_v9, %v504_v32 }
 0x18f   : >> { %v510_v34 = vsel %vm508_vm4, 1.0, %v1118_v33  ;;  %v520_v23 = vsel %vm508_vm4, 1e+30, %v1087_v23  }
 0x190   : >> { %v512_v35 = vpack.c.bf16 %v510_v34, %v510_v34 }
 0x192   : >> { %518 = vst.msk [vmem:[%s516_s12] sm:$0xf] %vm517_vm5, %v512_v35 }
 0x195   : >> { %v507_v36 = vpop.xlane.xlu1 %506 }
 0x196   : >> { %vm509_vm6 = vcmp.eq.f32.partialorder %v482_v9, %v507_v36  ;;  %487 = sbr.rel (!%p485_p4) target bundleno = 161 (0xa1), region = 121 }
 0x197   : >> { %v511_v37 = vsel %vm509_vm6, 1.0, %v1118_v33  ;;  %v521_v22 = vsel %vm509_vm6, 1e+30, %v1083_v22  }
 0x198   : >> { %v513_v38 = vpack.c.bf16 %v511_v37, %v511_v37 }
 0x19a   : >> { %519 = vst.msk [vmem:[%s516_s12 + $0x4] sm:$0xf] %vm517_vm5, %v513_v38 }
 0x19b LB: >> { %602 = vmatpush.bf16.msra.mxu0 %v572_v55  ;;  %s942_s23 = sshll.u32 %s1103_s21, 3  ;;  %s578_s21 = sadd.s32 1, %s1103_s21   ;;  %s1103_s21 = sphi %s1101_s21, %s578_s21   ;;  %v1099_v58 = vphi %v1097_v58, %v1098_v58   ;;  %v1095_v57 = vphi %v1093_v57, %v1094_v57  }
 0x19c   : >> { %s583_s24 = scalar_lea.vmem [#allocation2], %s942_s23  ;;  %p575_p5 = scmp.ge.s32.totalorder %s578_s21, 4  }
 0x19d   : > { %v620_v0 = vld [vmem:[%s1285_s5] sm:$0xf] (%p575_p5)  ;;  %vm626_vm9 = vcmask (%p575_p5), 1043456   ;;  %vm622_vm12 = vcmask (%p575_p5), 64512   ;;  %v1105_v20 = vmov (%p575_p5), -1e+30  }
 0x19e   : > { %v621_v1 = vld [vmem:[%s1286_s6] sm:$0xf] (%p575_p5)  ;;  %v1109_v21 = vmov (%p575_p5), -1e+30   ;;  %s1113_s14 = smov (%p575_p5), 0  }
 0x19f   : > { %v628_v4 = vsel (%p575_p5), %vm626_vm9, %v621_v1, 0  ;;  %v644_v5 = vld [vmem:[%s1287_s7] sm:$0xf] (%p575_p5) }
 0x1a0   : > { %v650_v6 = vsel (%p575_p5), %vm626_vm9, %v644_v5, 0  ;;  %v1033_v12 = vld [vmem:[%s1288_s8] ss:$0 sm:$0xff] (%p575_p5) }
 0x1a1   : >> { %v943_v59 = vld [vmem:[%s583_s24] sm:$0xff]  ;;  %659 = vmatpush.bf16.msra.mxu1 (%p575_p5), %v650_v6 }
 0x1a2   : >> { %921 = vmatmul.msk.bf16.vlgmr.msra.gmra.mxu0 %vm491_vm1, %v943_v59 }
 0x1a3   : > { %637 = vmatpush.bf16.msra.mxu0 (%p575_p5), %v628_v4 }
 0x21f   : >> { %v604_v60 = vpop.f32.mrf.mxu0 }
 0x220   : >> { %v609_v61 = vmax.f32 %v1099_v58, %v604_v60  }
 0x222   : >> { %v1098_v58 = vmov %v609_v61   ;;  %v611_v2 = vadd.f32 (%p575_p5), %v609_v61, %v568_v52 }
 0x224   : > { %vm613_vm10 = vcmp.gt.f32.partialorder (%p575_p5), %v611_v2, 0.0  ;;  %v615_v7 = vmul.f32 (%p575_p5), 0.2, %v611_v2 }
 0x226   : > { %577 = sbr.rel (!%p575_p5) target bundleno = 411 (0x19b), region = 132  ;;  %v617_v9 = vsel (%p575_p5), %vm613_vm10, %v611_v2, %v615_v7 }
 0x227   : >> { %v606_v62 = vpop.f32.mrf.mxu0 }
 0x228   : >> { %v610_v63 = vmax.f32 %v1095_v57, %v606_v62  }
 0x22a   : >> { %v1094_v57 = vmov %v610_v63   ;;  %v612_v3 = vadd.f32 (%p575_p5), %v610_v63, %v570_v56 }
 0x22c   : > { %vm614_vm11 = vcmp.gt.f32.partialorder %v612_v3, 0.0  ;;  %v616_v8 = vmul.f32 0.2, %v612_v3 }
 0x22e   : > { %v618_v10 = vsel %vm614_vm11, %v612_v3, %v616_v8 }
 0x22f   : > { %v619_v11 = vpack.c.bf16 %v618_v10, %v617_v9 }
 0x231   : > { %922 = vmatmul.msk.bf16.vlgmr.msra.gmra.mxu0 %vm622_vm12, %v619_v11  ;;  %923 = vmatmul.msk.bf16.vlgmr.msra.gmra.mxu1 %vm622_vm12, %v619_v11 }
 0x2ae   : > { %v639_v13 = vpop.f32.mrf.mxu0  ;;  %v661_v14 = vpop.f32.mrf.mxu1 }
 0x2af   : > { %v662_v15 = vadd.f32 %v1033_v12, %v661_v14 }
 0x2b6   : > { %v641_v16 = vpop.f32.mrf.mxu0  ;;  %v663_v17 = vpop.f32.mrf.mxu1 }
 0x2b7   : > { %v666_v18 = vpack.c.bf16 %v641_v16, %v639_v13  ;;  %v664_v19 = vadd.f32 %v1033_v12, %v663_v17 }
 0x2b8 LB: >> { %s944_s15 = sshll.u32 %s1115_s14, 3  ;;  %s672_s14 = sadd.s32 1, %s1115_s14   ;;  %s1115_s14 = sphi %s1113_s14, %s672_s14   ;;  %v1111_v21 = vphi %v1109_v21, %v1110_v21   ;;  %v1107_v20 = vphi %v1105_v20, %v1106_v20  }
 0x2b9   : >> { %696 = vmatpush.bf16.msra.mxu0 %v666_v18  ;;  %s677_s16 = scalar_lea.vmem [#allocation2], %s944_s15  ;;  %p669_p6 = scmp.ge.s32.totalorder %s672_s14, 4  }
 0x2ba   : >> { %v945_v22 = vld [vmem:[%s677_s16] sm:$0xff]  ;;  %v741_v27 = vsel (%p669_p6), %vm626_vm9, %v620_v0, 0  ;;  %v1120_v37 = vmov (%p669_p6), 16.0   ;;  %vm763_vm15 = vcmask (%p669_p6), 261120   ;;  %s1121_s24 = smov (%p669_p6), 32  }
 0x2bb   : > { %v946_v28 = vld [vmem:[%s1289_s9] sm:$0xff] (%p669_p6)  ;;  %750 = vmatpush.bf16.msra.mxu1 (%p669_p6), %v741_v27  ;;  %1035 = vrcp.f32 (%p669_p6), %v1120_v37 }
 0x2bc   : >> { %930 = vmatmul.msk.bf16.vlgmr.msra.gmra.mxu0 %vm491_vm1, %v945_v22  ;;  %v1034_v41 = vld [vmem:[%s1290_s10] ss:$0 sm:$0xff] (%p669_p6) }
 0x2bd   : > { %733 = vmatpush.bf16.msra.mxu0 (%p669_p6), %v946_v28 }
 0x2be   : > { %936 = vmatmul.msk.bf16.vlgmr.msra.gmra.mxu1 (%p669_p6), %vm622_vm12, %v619_v11 }
 0x2c1   : > { %v1036_v39 = vpop.eup (%p669_p6), %1035 }
 0x2c2   : > { %v783_v44 = vmul.f32 (%p669_p6), 16.0, %v1036_v39  ;;  %vm787_vm0 = vweird.f32 (%p669_p6), %v1036_v39 }
 0x2c4   : > { %v784_v48 = vsub.f32 (%p669_p6), 1.0, %v783_v44 }
 0x2c6   : > { %v785_v56 = vmul.f32 (%p669_p6), %v1036_v39, %v784_v48 }
 0x2c8   : > { %v786_v59 = vadd.f32 (%p669_p6), %v1036_v39, %v785_v56 }
 0x2ca   : > { %v788_v62 = vsel (%p669_p6), %vm787_vm0, %v1036_v39, %v786_v59 }
 0x339   : >> { %v698_v23 = vpop.f32.mrf.mxu0 }
 0x33a   : >> { %v703_v24 = vmax.f32 %v1111_v21, %v698_v23  }
 0x33b   : > { %v752_v36 = vpop.f32.mrf.mxu1 (%p669_p6) }
 0x33c   : >> { %v1110_v21 = vmov %v703_v24   ;;  %v705_v29 = vadd.f32 (%p669_p6), %v703_v24, %v662_v15 }
 0x33e   : > { %vm707_vm13 = vcmp.gt.f32.partialorder (%p669_p6), %v705_v29, 0.0  ;;  %v709_v31 = vmul.f32 (%p669_p6), 0.2, %v705_v29 }
 0x340   : > { %671 = sbr.rel (!%p669_p6) target bundleno = 696 (0x2b8), region = 143  ;;  %v711_v33 = vsel (%p669_p6), %vm707_vm13, %v705_v29, %v709_v31 }
 0x341   : >> { %v700_v25 = vpop.f32.mrf.mxu0 }
 0x342   : >> { %v704_v26 = vmax.f32 %v1107_v20, %v700_v25  }
 0x343   : > { %v754_v42 = vpop.f32.mrf.mxu1 (%p669_p6) }
 0x344   : >> { %v1106_v20 = vmov %v704_v26   ;;  %v706_v30 = vadd.f32 (%p669_p6), %v704_v26, %v664_v19 }
 0x346   : > { %vm708_vm14 = vcmp.gt.f32.partialorder %v706_v30, 0.0  ;;  %v710_v32 = vmul.f32 0.2, %v706_v30 }
 0x348   : > { %v712_v34 = vsel %vm708_vm14, %v706_v30, %v710_v32 }
 0x349   : > { %v713_v35 = vpack.c.bf16 %v712_v34, %v711_v33 }
 0x34b   : > { %935 = vmatmul.msk.bf16.vlgmr.msra.gmra.mxu0 %vm491_vm1, %v713_v35  ;;  %vm795_vm1 = vcmask 516096  }
 0x3c8   : > { %v735_v38 = vpop.f32.mrf.mxu0 }
 0x3c9   : > { %v753_v40 = vadd.f32 %v752_v36, %v735_v38 }
 0x3cb   : > { %v761_v45 = vadd.f32 %v1034_v41, %v753_v40 }
 0x3cd   : > { %v764_v49 = vsel %vm763_vm15, %v761_v45, -inf  ;;  %v773_v50 = vsel %vm763_vm15, %v761_v45, 0.0 }
 0x3d0   : > { %v737_v43 = vpop.f32.mrf.mxu0 }
 0x3d1   : > { %v755_v46 = vadd.f32 %v754_v42, %v737_v43 }
 0x3d3   : > { %v762_v47 = vadd.f32 %v1034_v41, %v755_v46 }
 0x3d5   : > { %v765_v51 = vsel %vm763_vm15, %v762_v47, -inf  ;;  %v774_v52 = vsel %vm763_vm15, %v762_v47, 0.0 }
 0x3d6   : > { %v766_v53 = vmax.f32 %v764_v49, %v765_v51  ;;  %v775_v54 = vadd.f32 %v774_v52, %v773_v50 }
 0x3d8   : > { %v776_v55 = vrot.slane %v775_v54, 4  ;;  %v767_v1 = vrot.slane %v766_v53, 4 }
 0x3da   : > { %v777_v57 = vadd.f32 %v776_v55, %v775_v54  ;;  %v768_v2 = vmax.f32 %v766_v53, %v767_v1 }
 0x3dc   : > { %v778_v58 = vrot.slane %v777_v57, 2  ;;  %v769_v3 = vrot.slane %v768_v2, 2 }
 0x3de   : > { %v779_v60 = vadd.f32 %v778_v58, %v777_v57  ;;  %v770_v4 = vmax.f32 %v768_v2, %v769_v3 }
 0x3e0   : > { %v780_v61 = vrot.slane %v779_v60, 1  ;;  %v771_v5 = vrot.slane %v770_v4, 1 }
 0x3e2   : > { %v781_v63 = vadd.f32 %v780_v61, %v779_v60  ;;  %v772_v6 = vmax.f32 %v770_v4, %v771_v5 }
 0x3e4   : > { %v789_v0 = vmul.f32 %v788_v62, %v781_v63 }
 0x3e6   : > { %791 = vrot.lane.b32.xlu0 %v789_v0, %s1121_s24 }
 0x458   : > { %v792_v7 = vpop.permute.xlu0 %791 }
 0x459   : > { %v794_v8 = vsel %vm763_vm15, %v772_v6, %v792_v7 }
 0x45a   : > { %796 = vst.msk [vmem:[%s402_s22] sm:$0x1] %vm795_vm1, %v794_v8 }
 0x45b PF: > { %s21_s17 = sadd.s32 1, %s1079_s17  }
 0x45c   : > { %p18_p7 = scmp.ge.s32.totalorder %s21_s17, 4  }
 0x45e   :  { %20 = sbr.rel (!%p18_p7) target bundleno = 1 (0x1), region = 154 }

</bundles_post_ra>
